<compile_context>
chip_gen: v6e
topology: v6e:2x2x1
jax: 0.10.0
libtpu: 0.0.40
codegen_flags: <defaults>
</compile_context>

<pallas_src>
import math

import jax
import jax.numpy as jnp
from jax.experimental import pallas as pl
from jax.experimental.pallas import tpu as pltpu

SUB = 8            # sublanes per vreg
LANE = 128         # lanes per vreg
TILE = SUB * LANE  # vertices processed per grid step (one (8,128) tile / coord)


# ----------------------------------------------------------------------------
# Pallas kernel: per-vertex contact detection + reductions for both contacts.
# ----------------------------------------------------------------------------
def _contact_kernel(params_ref, x_ref, valid_ref, out_ref):
    # params_ref (SMEM, f32[26]): R(9, row-major), shift(3)=translation+mass_center,
    #   v(3), omega(3), n_planar(3), thr_planar(1), n_up(3), thr_up(1)
    # x_ref     (VMEM, f32[3, 8, 128]): body-frame vertices for this tile,
    #   plane c = coord c, vertex index = sublane*128 + lane (padding = 0).
    # valid_ref (VMEM, f32[8, 128]): 1.0 for real vertices, 0.0 for padding.
    # out_ref   (VMEM, f32[8, 128]): lane-dense accumulator resident across the
    #   vertex-tile grid axis.  Rows 0..3 = [count, sum_x, sum_y, sum_z] for the
    #   planar contact, rows 4..7 = same for the [0,1,0] contact.
    @pl.when(pl.program_id(0) == 0)
    def _():
        out_ref[...] = jnp.zeros_like(out_ref)

    R = [params_ref[i] for i in range(9)]
    t = [params_ref[9 + i] for i in range(3)]
    v = [params_ref[12 + i] for i in range(3)]
    w = [params_ref[15 + i] for i in range(3)]

    x0 = x_ref[0]          # (8, 128) sublane+lane dense
    x1 = x_ref[1]
    x2 = x_ref[2]
    valid = valid_ref[...]

    # r_world = R @ x  (per vertex) -- 9 scalar-broadcast FMAs on the VPU.
    r0 = R[0] * x0 + R[1] * x1 + R[2] * x2
    r1 = R[3] * x0 + R[4] * x1 + R[5] * x2
    r2 = R[6] * x0 + R[7] * x1 + R[8] * x2

    # world position xi = translation + R x + mass_center
    xi0 = t[0] + r0
    xi1 = t[1] + r1
    xi2 = t[2] + r2

    # world velocity vi = v + omega x (R x)
    vi0 = v[0] + (w[1] * r2 - w[2] * r1)
    vi1 = v[1] + (w[2] * r0 - w[0] * r2)
    vi2 = v[2] + (w[0] * r1 - w[1] * r0)

    for c in range(2):  # contact 0: planar slope, contact 1: normal [0,1,0]
        base = 18 + 4 * c
        n0 = params_ref[base + 0]
        n1 = params_ref[base + 1]
        n2 = params_ref[base + 2]
        thr = params_ref[base + 3]
        d = n0 * xi0 + n1 * xi1 + n2 * xi2
        rel = n0 * vi0 + n1 * vi1 + n2 * vi2
        m = jnp.where((d < thr) & (rel < 0.0), valid, 0.0)
        row = 4 * c
        # sublane-reduce straight into the lane-dense accumulator rows
        out_ref[row + 0:row + 1, :] += jnp.sum(m, axis=0, keepdims=True)
        out_ref[row + 1:row + 2, :] += jnp.sum(m * x0, axis=0, keepdims=True)
        out_ref[row + 2:row + 3, :] += jnp.sum(m * x1, axis=0, keepdims=True)
        out_ref[row + 3:row + 4, :] += jnp.sum(m * x2, axis=0, keepdims=True)


def contact_reductions(params, x_pad, valid):
    num_tiles = x_pad.shape[1] // SUB
    out = pl.pallas_call(
        _contact_kernel,
        out_shape=jax.ShapeDtypeStruct((SUB, LANE), jnp.float32),
        grid=(num_tiles,),
        in_specs=[
            pl.BlockSpec(memory_space=pltpu.MemorySpace.SMEM),
            pl.BlockSpec((3, SUB, LANE), lambda i: (0, i, 0)),
            pl.BlockSpec((SUB, LANE), lambda i: (i, 0)),
        ],
        out_specs=pl.BlockSpec((SUB, LANE), lambda i: (0, 0)),
        compiler_params=pltpu.CompilerParams(
            dimension_semantics=("arbitrary",)),  # output is a resident accumulator
    )(params, x_pad, valid)
    # final 128-wide lane reduction of the 8 partial rows (tiny, fused by XLA)
    return jnp.sum(out, axis=1)  # (8,)


# ----------------------------------------------------------------------------
# Plain-JAX glue (3x3 / quaternion math, identical formulas to the module).
# ----------------------------------------------------------------------------
def quat_mul(a, b):
    return jnp.stack(
        [
            a[0] * b[0] - a[1] * b[1] - a[2] * b[2] - a[3] * b[3],
            a[0] * b[1] + a[1] * b[0] + a[2] * b[3] - a[3] * b[2],
            a[0] * b[2] + a[2] * b[0] + a[3] * b[1] - a[1] * b[3],
            a[0] * b[3] + a[3] * b[0] + a[1] * b[2] - a[2] * b[1],
        ]
    )


def quat_to_matrix(q):
    q = q / jnp.linalg.norm(q)
    w, x, y, z = q[0], q[1], q[2], q[3]
    return jnp.stack(
        [
            jnp.stack([1 - 2 * y * y - 2 * z * z, 2 * x * y - 2 * w * z, 2 * x * z + 2 * w * y]),
            jnp.stack([2 * x * y + 2 * w * z, 1 - 2 * x * x - 2 * z * z, 2 * y * z - 2 * w * x]),
            jnp.stack([2 * x * z - 2 * w * y, 2 * y * z + 2 * w * x, 1 - 2 * x * x - 2 * y * y]),
        ]
    )


def cross_matrix(a):
    z = jnp.zeros((), jnp.float32)
    return jnp.stack(
        [
            jnp.stack([z, -a[2], a[1]]),
            jnp.stack([a[2], z, -a[0]]),
            jnp.stack([-a[1], a[0], z]),
        ]
    )


def inv3(m):
    a, b, c = m[0, 0], m[0, 1], m[0, 2]
    d, e, f = m[1, 0], m[1, 1], m[1, 2]
    g, h, i = m[2, 0], m[2, 1], m[2, 2]
    A = e * i - f * h
    B = -(d * i - f * g)
    C = d * h - e * g
    D = -(b * i - c * h)
    E = a * i - c * g
    F = -(a * h - b * g)
    G = b * f - c * e
    H = -(a * f - c * d)
    I = a * e - b * d
    det = a * A + b * B + c * C
    adj = jnp.stack([jnp.stack([A, D, G]), jnp.stack([B, E, H]), jnp.stack([C, F, I])])
    return adj / det


def collision_response(count, sum_pos, R, v_f, omega_f, n, kn, mu, inv_mass, I_inv):
    # data-dependent `if num_collision > 0` branch expressed as jnp.where
    safe_count = jnp.maximum(count, 1.0)
    collision_ri = sum_pos / safe_count
    collision_Ri = R @ collision_ri
    vi = v_f + jnp.cross(omega_f, collision_Ri)
    v_i_n = jnp.dot(vi, n) * n
    v_i_t = vi - v_i_n
    vn_new = -kn * v_i_n
    alpha = 1.0 - mu * (1.0 + kn) * (
        jnp.linalg.norm(v_i_n) / (jnp.linalg.norm(v_i_t) + 1e-6)
    )
    alpha = jnp.maximum(alpha, 0.0)  # `if alpha < 0: alpha = 0`
    vt_new = alpha * v_i_t
    vi_new = vn_new + vt_new
    C = cross_matrix(collision_Ri)
    k = inv_mass * jnp.eye(3, dtype=jnp.float32) - C @ I_inv @ C
    J = inv3(k) @ (vi_new - vi)
    v_out = J * inv_mass
    omega_out = I_inv @ C @ J
    has = count > 0.0
    return jnp.where(has, v_out, 0.0), jnp.where(has, omega_out, 0.0)


def forward(
    translation_f,
    q_f,
    v_f,
    omega_f,
    x_pad,
    valid,
    mass_center,
    inertia_ref,
    dt,
    kn,
    mu,
    lin_damp,
    ang_damp,
    c_slope,
    s_slope,
    init_height,
    inv_mass,
):
    gravity = jnp.array([0.0, -9.8, 0.0], jnp.float32)
    v_out = (v_f + gravity * dt) * lin_damp
    omega_out = omega_f * ang_damp

    R = quat_to_matrix(q_f)
    shift = translation_f + mass_center

    n_planar = jnp.array([-s_slope, c_slope, 0.0], jnp.float32)
    thr_planar = jnp.array([-c_slope * init_height], jnp.float32)
    n_up = jnp.array([0.0, 1.0, 0.0], jnp.float32)
    thr_up = jnp.array([0.0], jnp.float32)

    params = jnp.concatenate(
        [R.reshape(-1), shift, v_f, omega_f, n_planar, thr_planar, n_up, thr_up]
    ).astype(jnp.float32)

    red = contact_reductions(params, x_pad, valid)  # (8,)

    # World-frame inertia and its inverse are shared by both contacts.
    I_world = R @ inertia_ref @ R.T
    I_inv = inv3(I_world)

    normals = [n_planar, n_up]
    for c in range(2):  # order matches forward(): planar first, then [0,1,0]
        count = red[c * 4]
        sum_pos = red[c * 4 + 1: c * 4 + 4]
        dv, dw = collision_response(
            count, sum_pos, R, v_f, omega_f, normals[c], kn, mu, inv_mass, I_inv
        )
        v_out = v_out + dv
        omega_out = omega_out + dw

    wt = omega_out * dt * 0.5
    dq = quat_mul(jnp.concatenate([jnp.zeros((1,), jnp.float32), wt]), q_f)
    translation_next = translation_f + dt * v_out
    quat_new = q_f + dq
    q_next = quat_new / jnp.linalg.norm(quat_new)
    # torch forward returns (translation[f+1], quaternion[f+1]); v[f+1] / omega[f+1]
    # are stored as module state -- here they are v_out / omega_out.
    return translation_next, q_next


if __name__ == "__main__":
    key = jax.random.PRNGKey(0)
    N = 1500  # synthetic mesh vertex count (replaces trimesh.load_mesh); 2 tiles
    verts = jax.random.uniform(key, (N, 3), minval=-0.2, maxval=0.2, dtype=jnp.float32)
    mass_center = jnp.mean(verts, axis=0)  # plays the role of mesh.center_mass
    x_body = verts - mass_center  # == self.x

    # inertia_referance exactly as in RigidBodySimulator.init():
    # r = self.x[i] - self.mass_center  (self.x is already centered, so
    # mass_center is subtracted twice). Intentional: mirrors the reference
    # module verbatim to preserve forward-pass semantics.
    r = x_body - mass_center
    rr = jnp.sum(r * r, axis=1)
    inertia_ref = jnp.sum(
        rr[:, None, None] * jnp.eye(3, dtype=jnp.float32)[None]
        - r[:, :, None] * r[:, None, :],
        axis=0,
    )
    inv_mass = 1.0 / float(N)  # per-vertex mass = 1.0

    # pack vertices into the tiled sublane+lane dense kernel layout:
    # (3, num_tiles*8, 128); tile i covers vertices [i*1024, (i+1)*1024)
    num_tiles = -(-N // TILE)
    npad = num_tiles * TILE
    x_flat = jnp.zeros((3, npad), jnp.float32).at[:, :N].set(x_body.T)
    x_pad = x_flat.reshape(3, num_tiles * SUB, LANE)
    # precomputed 0/1 validity mask (no in-kernel iota / integer compares)
    valid = (jnp.arange(npad) < N).astype(jnp.float32).reshape(num_tiles * SUB, LANE)

    # options (deterministic, same roles as the module's `options` dict)
    substep = 1
    dt = 1.0 / 60.0 / substep
    kn, mu = 0.5, 0.2
    lin_damp, ang_damp = 0.999, 0.998
    slope_degree, init_height = 30.0, 0.1
    c_slope = math.cos(math.radians(slope_degree))
    s_slope = math.sin(math.radians(slope_degree))

    # frame-f state (chosen so some vertices are actually in contact)
    translation_f = jnp.array([0.0, -0.02, 0.0], jnp.float32)
    q_f = jnp.array([0.95, 0.05, 0.1, 0.02], jnp.float32)
    q_f = q_f / jnp.linalg.norm(q_f)
    v_f = jnp.array([0.1, -1.0, 0.0], jnp.float32)
    omega_f = jnp.array([0.0, 0.5, 0.3], jnp.float32)

    fwd = jax.jit(
        lambda t, q, v, w: forward(
            t, q, v, w, x_pad, valid, mass_center, inertia_ref, dt, kn, mu,
            lin_damp, ang_damp, c_slope, s_slope, init_height, inv_mass,
        )
    )
    t_next, q_next = fwd(translation_f, q_f, v_f, omega_f)
    jax.block_until_ready((t_next, q_next))
    print("KERNEL_OK")
</pallas_src>

<mosaic_0001>
module attributes {stable_mosaic.version = 11 : i64} {
  func.func @_contact_kernel(%arg0: i32, %arg1: memref<26xf32, #tpu.memory_space<smem>>, %arg2: memref<3x8x128xf32, #tpu.memory_space<vmem>>, %arg3: memref<8x128xf32, #tpu.memory_space<vmem>>, %arg4: memref<8x128xf32, #tpu.memory_space<vmem>>) attributes {dimension_semantics = [#tpu.dimension_semantics<arbitrary>], iteration_bounds = array<i64: 2>, scalar_prefetch = 0 : i64, scratch_operands = 0 : i64, tpu.core_type = #tpu.core_type<tc>, window_params = [{transform_indices = @transform_0, window_bounds = array<i64: 26>}, {transform_indices = @transform_1, window_bounds = array<i64: 3, 8, 128>}, {transform_indices = @transform_2, window_bounds = array<i64: 8, 128>}, {pipeline_mode = #tpu.pipeline_mode<synchronous>, transform_indices = @transform_3, window_bounds = array<i64: 8, 128>}]} {
    %c0_i32 = arith.constant 0 : i32
    %0 = arith.cmpi eq, %arg0, %c0_i32 : i32
    %1 = arith.extui %0 : i1 to i32
    %c0_i32_0 = arith.constant 0 : i32
    %2 = arith.cmpi ne, %1, %c0_i32_0 : i32
    scf.if %2 {
      %cst_55 = arith.constant 0.000000e+00 : f32
      %179 = vector.broadcast %cst_55 : f32 to vector<8x128xf32>
      %c0_56 = arith.constant 0 : index
      %c0_57 = arith.constant 0 : index
      %180 = vector.load %arg4[%c0_56, %c0_57] : memref<8x128xf32, #tpu.memory_space<vmem>>, vector<8x128xf32>
      tpu.vector_store %arg4[%c0_56, %c0_57], %179 {strides = array<i32>} : memref<8x128xf32, #tpu.memory_space<vmem>>, vector<8x128xf32>,
    } else {
    }
    %c0 = arith.constant 0 : index
    %3 = memref.load %arg1[%c0] : memref<26xf32, #tpu.memory_space<smem>>
    %c1 = arith.constant 1 : index
    %4 = memref.load %arg1[%c1] : memref<26xf32, #tpu.memory_space<smem>>
    %c2 = arith.constant 2 : index
    %5 = memref.load %arg1[%c2] : memref<26xf32, #tpu.memory_space<smem>>
    %c3 = arith.constant 3 : index
    %6 = memref.load %arg1[%c3] : memref<26xf32, #tpu.memory_space<smem>>
    %c4 = arith.constant 4 : index
    %7 = memref.load %arg1[%c4] : memref<26xf32, #tpu.memory_space<smem>>
    %c5 = arith.constant 5 : index
    %8 = memref.load %arg1[%c5] : memref<26xf32, #tpu.memory_space<smem>>
    %c6 = arith.constant 6 : index
    %9 = memref.load %arg1[%c6] : memref<26xf32, #tpu.memory_space<smem>>
    %c7 = arith.constant 7 : index
    %10 = memref.load %arg1[%c7] : memref<26xf32, #tpu.memory_space<smem>>
    %c8 = arith.constant 8 : index
    %11 = memref.load %arg1[%c8] : memref<26xf32, #tpu.memory_space<smem>>
    %c9 = arith.constant 9 : index
    %12 = memref.load %arg1[%c9] : memref<26xf32, #tpu.memory_space<smem>>
    %c10 = arith.constant 10 : index
    %13 = memref.load %arg1[%c10] : memref<26xf32, #tpu.memory_space<smem>>
    %c11 = arith.constant 11 : index
    %14 = memref.load %arg1[%c11] : memref<26xf32, #tpu.memory_space<smem>>
    %c12 = arith.constant 12 : index
    %15 = memref.load %arg1[%c12] : memref<26xf32, #tpu.memory_space<smem>>
    %c13 = arith.constant 13 : index
    %16 = memref.load %arg1[%c13] : memref<26xf32, #tpu.memory_space<smem>>
    %c14 = arith.constant 14 : index
    %17 = memref.load %arg1[%c14] : memref<26xf32, #tpu.memory_space<smem>>
    %c15 = arith.constant 15 : index
    %18 = memref.load %arg1[%c15] : memref<26xf32, #tpu.memory_space<smem>>
    %c16 = arith.constant 16 : index
    %19 = memref.load %arg1[%c16] : memref<26xf32, #tpu.memory_space<smem>>
    %c17 = arith.constant 17 : index
    %20 = memref.load %arg1[%c17] : memref<26xf32, #tpu.memory_space<smem>>
    %c0_1 = arith.constant 0 : index
    %c0_2 = arith.constant 0 : index
    %c0_3 = arith.constant 0 : index
    %21 = vector.load %arg2[%c0_1, %c0_2, %c0_3] : memref<3x8x128xf32, #tpu.memory_space<vmem>>, vector<1x8x128xf32>
    %22 = vector.shape_cast %21 : vector<1x8x128xf32> to vector<8x128xf32>
    %c1_4 = arith.constant 1 : index
    %c0_5 = arith.constant 0 : index
    %c0_6 = arith.constant 0 : index
    %23 = vector.load %arg2[%c1_4, %c0_5, %c0_6] : memref<3x8x128xf32, #tpu.memory_space<vmem>>, vector<1x8x128xf32>
    %24 = vector.shape_cast %23 : vector<1x8x128xf32> to vector<8x128xf32>
    %c2_7 = arith.constant 2 : index
    %c0_8 = arith.constant 0 : index
    %c0_9 = arith.constant 0 : index
    %25 = vector.load %arg2[%c2_7, %c0_8, %c0_9] : memref<3x8x128xf32, #tpu.memory_space<vmem>>, vector<1x8x128xf32>
    %26 = vector.shape_cast %25 : vector<1x8x128xf32> to vector<8x128xf32>
    %c0_10 = arith.constant 0 : index
    %c0_11 = arith.constant 0 : index
    %27 = vector.load %arg3[%c0_10, %c0_11] : memref<8x128xf32, #tpu.memory_space<vmem>>, vector<8x128xf32>
    %28 = vector.broadcast %3 : f32 to vector<8x128xf32>
    %29 = arith.mulf %28, %22 : vector<8x128xf32>
    %30 = vector.broadcast %4 : f32 to vector<8x128xf32>
    %31 = arith.mulf %30, %24 : vector<8x128xf32>
    %32 = arith.addf %29, %31 : vector<8x128xf32>
    %33 = vector.broadcast %5 : f32 to vector<8x128xf32>
    %34 = arith.mulf %33, %26 : vector<8x128xf32>
    %35 = arith.addf %32, %34 : vector<8x128xf32>
    %36 = vector.broadcast %6 : f32 to vector<8x128xf32>
    %37 = arith.mulf %36, %22 : vector<8x128xf32>
    %38 = vector.broadcast %7 : f32 to vector<8x128xf32>
    %39 = arith.mulf %38, %24 : vector<8x128xf32>
    %40 = arith.addf %37, %39 : vector<8x128xf32>
    %41 = vector.broadcast %8 : f32 to vector<8x128xf32>
    %42 = arith.mulf %41, %26 : vector<8x128xf32>
    %43 = arith.addf %40, %42 : vector<8x128xf32>
    %44 = vector.broadcast %9 : f32 to vector<8x128xf32>
    %45 = arith.mulf %44, %22 : vector<8x128xf32>
    %46 = vector.broadcast %10 : f32 to vector<8x128xf32>
    %47 = arith.mulf %46, %24 : vector<8x128xf32>
    %48 = arith.addf %45, %47 : vector<8x128xf32>
    %49 = vector.broadcast %11 : f32 to vector<8x128xf32>
    %50 = arith.mulf %49, %26 : vector<8x128xf32>
    %51 = arith.addf %48, %50 : vector<8x128xf32>
    %52 = vector.broadcast %12 : f32 to vector<8x128xf32>
    %53 = arith.addf %52, %35 : vector<8x128xf32>
    %54 = vector.broadcast %13 : f32 to vector<8x128xf32>
    %55 = arith.addf %54, %43 : vector<8x128xf32>
    %56 = vector.broadcast %14 : f32 to vector<8x128xf32>
    %57 = arith.addf %56, %51 : vector<8x128xf32>
    %58 = vector.broadcast %19 : f32 to vector<8x128xf32>
    %59 = arith.mulf %58, %51 : vector<8x128xf32>
    %60 = vector.broadcast %20 : f32 to vector<8x128xf32>
    %61 = arith.mulf %60, %43 : vector<8x128xf32>
    %62 = arith.subf %59, %61 : vector<8x128xf32>
    %63 = vector.broadcast %15 : f32 to vector<8x128xf32>
    %64 = arith.addf %63, %62 : vector<8x128xf32>
    %65 = vector.broadcast %20 : f32 to vector<8x128xf32>
    %66 = arith.mulf %65, %35 : vector<8x128xf32>
    %67 = vector.broadcast %18 : f32 to vector<8x128xf32>
    %68 = arith.mulf %67, %51 : vector<8x128xf32>
    %69 = arith.subf %66, %68 : vector<8x128xf32>
    %70 = vector.broadcast %16 : f32 to vector<8x128xf32>
    %71 = arith.addf %70, %69 : vector<8x128xf32>
    %72 = vector.broadcast %18 : f32 to vector<8x128xf32>
    %73 = arith.mulf %72, %43 : vector<8x128xf32>
    %74 = vector.broadcast %19 : f32 to vector<8x128xf32>
    %75 = arith.mulf %74, %35 : vector<8x128xf32>
    %76 = arith.subf %73, %75 : vector<8x128xf32>
    %77 = vector.broadcast %17 : f32 to vector<8x128xf32>
    %78 = arith.addf %77, %76 : vector<8x128xf32>
    %c18 = arith.constant 18 : index
    %79 = memref.load %arg1[%c18] : memref<26xf32, #tpu.memory_space<smem>>
    %c19 = arith.constant 19 : index
    %80 = memref.load %arg1[%c19] : memref<26xf32, #tpu.memory_space<smem>>
    %c20 = arith.constant 20 : index
    %81 = memref.load %arg1[%c20] : memref<26xf32, #tpu.memory_space<smem>>
    %c21 = arith.constant 21 : index
    %82 = memref.load %arg1[%c21] : memref<26xf32, #tpu.memory_space<smem>>
    %83 = vector.broadcast %79 : f32 to vector<8x128xf32>
    %84 = arith.mulf %83, %53 : vector<8x128xf32>
    %85 = vector.broadcast %80 : f32 to vector<8x128xf32>
    %86 = arith.mulf %85, %55 : vector<8x128xf32>
    %87 = arith.addf %84, %86 : vector<8x128xf32>
    %88 = vector.broadcast %81 : f32 to vector<8x128xf32>
    %89 = arith.mulf %88, %57 : vector<8x128xf32>
    %90 = arith.addf %87, %89 : vector<8x128xf32>
    %91 = vector.broadcast %79 : f32 to vector<8x128xf32>
    %92 = arith.mulf %91, %64 : vector<8x128xf32>
    %93 = vector.broadcast %80 : f32 to vector<8x128xf32>
    %94 = arith.mulf %93, %71 : vector<8x128xf32>
    %95 = arith.addf %92, %94 : vector<8x128xf32>
    %96 = vector.broadcast %81 : f32 to vector<8x128xf32>
    %97 = arith.mulf %96, %78 : vector<8x128xf32>
    %98 = arith.addf %95, %97 : vector<8x128xf32>
    %99 = vector.broadcast %82 : f32 to vector<8x128xf32>
    %100 = arith.cmpf olt, %90, %99 : vector<8x128xf32>
    %cst = arith.constant 0.000000e+00 : f32
    %101 = vector.broadcast %cst : f32 to vector<8x128xf32>
    %102 = arith.cmpf olt, %98, %101 : vector<8x128xf32>
    %103 = arith.andi %100, %102 : vector<8x128xi1>
    %cst_12 = arith.constant 0.000000e+00 : f32
    %104 = vector.broadcast %cst_12 : f32 to vector<8x128xf32>
    %105 = arith.select %103, %27, %104 : vector<8x128xi1>, vector<8x128xf32>
    %c0_13 = arith.constant 0 : index
    %c0_14 = arith.constant 0 : index
    %106 = vector.load %arg4[%c0_13, %c0_14] : memref<8x128xf32, #tpu.memory_space<vmem>>, vector<1x128xf32>
    %cst_15 = arith.constant dense<0.000000e+00> : vector<128xf32>
    %107 = vector.multi_reduction <add>, %105, %cst_15 [0] : vector<8x128xf32> to vector<128xf32>
    %108 = vector.shape_cast %107 : vector<128xf32> to vector<1x128xf32>
    %109 = arith.addf %106, %108 : vector<1x128xf32>
    %c0_16 = arith.constant 0 : index
    %c0_17 = arith.constant 0 : index
    %110 = vector.load %arg4[%c0_16, %c0_17] : memref<8x128xf32, #tpu.memory_space<vmem>>, vector<1x128xf32>
    tpu.vector_store %arg4[%c0_16, %c0_17], %109 {strides = array<i32>} : memref<8x128xf32, #tpu.memory_space<vmem>>, vector<1x128xf32>,
    %c1_18 = arith.constant 1 : index
    %c0_19 = arith.constant 0 : index
    %111 = vector.load %arg4[%c1_18, %c0_19] : memref<8x128xf32, #tpu.memory_space<vmem>>, vector<1x128xf32>
    %112 = arith.mulf %105, %22 : vector<8x128xf32>
    %cst_20 = arith.constant dense<0.000000e+00> : vector<128xf32>
    %113 = vector.multi_reduction <add>, %112, %cst_20 [0] : vector<8x128xf32> to vector<128xf32>
    %114 = vector.shape_cast %113 : vector<128xf32> to vector<1x128xf32>
    %115 = arith.addf %111, %114 : vector<1x128xf32>
    %c1_21 = arith.constant 1 : index
    %c0_22 = arith.constant 0 : index
    %116 = vector.load %arg4[%c1_21, %c0_22] : memref<8x128xf32, #tpu.memory_space<vmem>>, vector<1x128xf32>
    tpu.vector_store %arg4[%c1_21, %c0_22], %115 {strides = array<i32>} : memref<8x128xf32, #tpu.memory_space<vmem>>, vector<1x128xf32>,
    %c2_23 = arith.constant 2 : index
    %c0_24 = arith.constant 0 : index
    %117 = vector.load %arg4[%c2_23, %c0_24] : memref<8x128xf32, #tpu.memory_space<vmem>>, vector<1x128xf32>
    %118 = arith.mulf %105, %24 : vector<8x128xf32>
    %cst_25 = arith.constant dense<0.000000e+00> : vector<128xf32>
    %119 = vector.multi_reduction <add>, %118, %cst_25 [0] : vector<8x128xf32> to vector<128xf32>
    %120 = vector.shape_cast %119 : vector<128xf32> to vector<1x128xf32>
    %121 = arith.addf %117, %120 : vector<1x128xf32>
    %c2_26 = arith.constant 2 : index
    %c0_27 = arith.constant 0 : index
    %122 = vector.load %arg4[%c2_26, %c0_27] : memref<8x128xf32, #tpu.memory_space<vmem>>, vector<1x128xf32>
    tpu.vector_store %arg4[%c2_26, %c0_27], %121 {strides = array<i32>} : memref<8x128xf32, #tpu.memory_space<vmem>>, vector<1x128xf32>,
    %c3_28 = arith.constant 3 : index
    %c0_29 = arith.constant 0 : index
    %123 = vector.load %arg4[%c3_28, %c0_29] : memref<8x128xf32, #tpu.memory_space<vmem>>, vector<1x128xf32>
    %124 = arith.mulf %105, %26 : vector<8x128xf32>
    %cst_30 = arith.constant dense<0.000000e+00> : vector<128xf32>
    %125 = vector.multi_reduction <add>, %124, %cst_30 [0] : vector<8x128xf32> to vector<128xf32>
    %126 = vector.shape_cast %125 : vector<128xf32> to vector<1x128xf32>
    %127 = arith.addf %123, %126 : vector<1x128xf32>
    %c3_31 = arith.constant 3 : index
    %c0_32 = arith.constant 0 : index
    %128 = vector.load %arg4[%c3_31, %c0_32] : memref<8x128xf32, #tpu.memory_space<vmem>>, vector<1x128xf32>
    tpu.vector_store %arg4[%c3_31, %c0_32], %127 {strides = array<i32>} : memref<8x128xf32, #tpu.memory_space<vmem>>, vector<1x128xf32>,
    %c22 = arith.constant 22 : index
    %129 = memref.load %arg1[%c22] : memref<26xf32, #tpu.memory_space<smem>>
    %c23 = arith.constant 23 : index
    %130 = memref.load %arg1[%c23] : memref<26xf32, #tpu.memory_space<smem>>
    %c24 = arith.constant 24 : index
    %131 = memref.load %arg1[%c24] : memref<26xf32, #tpu.memory_space<smem>>
    %c25 = arith.constant 25 : index
    %132 = memref.load %arg1[%c25] : memref<26xf32, #tpu.memory_space<smem>>
    %133 = vector.broadcast %129 : f32 to vector<8x128xf32>
    %134 = arith.mulf %133, %53 : vector<8x128xf32>
    %135 = vector.broadcast %130 : f32 to vector<8x128xf32>
    %136 = arith.mulf %135, %55 : vector<8x128xf32>
    %137 = arith.addf %134, %136 : vector<8x128xf32>
    %138 = vector.broadcast %131 : f32 to vector<8x128xf32>
    %139 = arith.mulf %138, %57 : vector<8x128xf32>
    %140 = arith.addf %137, %139 : vector<8x128xf32>
    %141 = vector.broadcast %129 : f32 to vector<8x128xf32>
    %142 = arith.mulf %141, %64 : vector<8x128xf32>
    %143 = vector.broadcast %130 : f32 to vector<8x128xf32>
    %144 = arith.mulf %143, %71 : vector<8x128xf32>
    %145 = arith.addf %142, %144 : vector<8x128xf32>
    %146 = vector.broadcast %131 : f32 to vector<8x128xf32>
    %147 = arith.mulf %146, %78 : vector<8x128xf32>
    %148 = arith.addf %145, %147 : vector<8x128xf32>
    %149 = vector.broadcast %132 : f32 to vector<8x128xf32>
    %150 = arith.cmpf olt, %140, %149 : vector<8x128xf32>
    %cst_33 = arith.constant 0.000000e+00 : f32
    %151 = vector.broadcast %cst_33 : f32 to vector<8x128xf32>
    %152 = arith.cmpf olt, %148, %151 : vector<8x128xf32>
    %153 = arith.andi %150, %152 : vector<8x128xi1>
    %cst_34 = arith.constant 0.000000e+00 : f32
    %154 = vector.broadcast %cst_34 : f32 to vector<8x128xf32>
    %155 = arith.select %153, %27, %154 : vector<8x128xi1>, vector<8x128xf32>
    %c4_35 = arith.constant 4 : index
    %c0_36 = arith.constant 0 : index
    %156 = vector.load %arg4[%c4_35, %c0_36] : memref<8x128xf32, #tpu.memory_space<vmem>>, vector<1x128xf32>
    %cst_37 = arith.constant dense<0.000000e+00> : vector<128xf32>
    %157 = vector.multi_reduction <add>, %155, %cst_37 [0] : vector<8x128xf32> to vector<128xf32>
    %158 = vector.shape_cast %157 : vector<128xf32> to vector<1x128xf32>
    %159 = arith.addf %156, %158 : vector<1x128xf32>
    %c4_38 = arith.constant 4 : index
    %c0_39 = arith.constant 0 : index
    %160 = vector.load %arg4[%c4_38, %c0_39] : memref<8x128xf32, #tpu.memory_space<vmem>>, vector<1x128xf32>
    tpu.vector_store %arg4[%c4_38, %c0_39], %159 {strides = array<i32>} : memref<8x128xf32, #tpu.memory_space<vmem>>, vector<1x128xf32>,
    %c5_40 = arith.constant 5 : index
    %c0_41 = arith.constant 0 : index
    %161 = vector.load %arg4[%c5_40, %c0_41] : memref<8x128xf32, #tpu.memory_space<vmem>>, vector<1x128xf32>
    %162 = arith.mulf %155, %22 : vector<8x128xf32>
    %cst_42 = arith.constant dense<0.000000e+00> : vector<128xf32>
    %163 = vector.multi_reduction <add>, %162, %cst_42 [0] : vector<8x128xf32> to vector<128xf32>
    %164 = vector.shape_cast %163 : vector<128xf32> to vector<1x128xf32>
    %165 = arith.addf %161, %164 : vector<1x128xf32>
    %c5_43 = arith.constant 5 : index
    %c0_44 = arith.constant 0 : index
    %166 = vector.load %arg4[%c5_43, %c0_44] : memref<8x128xf32, #tpu.memory_space<vmem>>, vector<1x128xf32>
    tpu.vector_store %arg4[%c5_43, %c0_44], %165 {strides = array<i32>} : memref<8x128xf32, #tpu.memory_space<vmem>>, vector<1x128xf32>,
    %c6_45 = arith.constant 6 : index
    %c0_46 = arith.constant 0 : index
    %167 = vector.load %arg4[%c6_45, %c0_46] : memref<8x128xf32, #tpu.memory_space<vmem>>, vector<1x128xf32>
    %168 = arith.mulf %155, %24 : vector<8x128xf32>
    %cst_47 = arith.constant dense<0.000000e+00> : vector<128xf32>
    %169 = vector.multi_reduction <add>, %168, %cst_47 [0] : vector<8x128xf32> to vector<128xf32>
    %170 = vector.shape_cast %169 : vector<128xf32> to vector<1x128xf32>
    %171 = arith.addf %167, %170 : vector<1x128xf32>
    %c6_48 = arith.constant 6 : index
    %c0_49 = arith.constant 0 : index
    %172 = vector.load %arg4[%c6_48, %c0_49] : memref<8x128xf32, #tpu.memory_space<vmem>>, vector<1x128xf32>
    tpu.vector_store %arg4[%c6_48, %c0_49], %171 {strides = array<i32>} : memref<8x128xf32, #tpu.memory_space<vmem>>, vector<1x128xf32>,
    %c7_50 = arith.constant 7 : index
    %c0_51 = arith.constant 0 : index
    %173 = vector.load %arg4[%c7_50, %c0_51] : memref<8x128xf32, #tpu.memory_space<vmem>>, vector<1x128xf32>
    %174 = arith.mulf %155, %26 : vector<8x128xf32>
    %cst_52 = arith.constant dense<0.000000e+00> : vector<128xf32>
    %175 = vector.multi_reduction <add>, %174, %cst_52 [0] : vector<8x128xf32> to vector<128xf32>
    %176 = vector.shape_cast %175 : vector<128xf32> to vector<1x128xf32>
    %177 = arith.addf %173, %176 : vector<1x128xf32>
    %c7_53 = arith.constant 7 : index
    %c0_54 = arith.constant 0 : index
    %178 = vector.load %arg4[%c7_53, %c0_54] : memref<8x128xf32, #tpu.memory_space<vmem>>, vector<1x128xf32>
    tpu.vector_store %arg4[%c7_53, %c0_54], %177 {strides = array<i32>} : memref<8x128xf32, #tpu.memory_space<vmem>>, vector<1x128xf32>,
    return
  }
  func.func @transform_0(%arg0: i32) -> i32 {
    %c0_i32 = arith.constant 0 : i32
    %c0_i32_0 = arith.constant 0 : i32
    return %c0_i32 : i32
  }
  func.func @transform_1(%arg0: i32) -> (i32, i32, i32) {
    %c0_i32 = arith.constant 0 : i32
    %c0_i32_0 = arith.constant 0 : i32
    %c0_i32_1 = arith.constant 0 : i32
    return %c0_i32, %arg0, %c0_i32_0 : i32, i32, i32
  }
  func.func @transform_2(%arg0: i32) -> (i32, i32) {
    %c0_i32 = arith.constant 0 : i32
    %c0_i32_0 = arith.constant 0 : i32
    return %arg0, %c0_i32 : i32, i32
  }
  func.func @transform_3(%arg0: i32) -> (i32, i32) {
    %c0_i32 = arith.constant 0 : i32
    %c0_i32_0 = arith.constant 0 : i32
    %c0_i32_1 = arith.constant 0 : i32
    return %c0_i32, %c0_i32_0 : i32, i32
  }
}

</mosaic_0001>

<bundles_post_ra>
// kernel: _lambda_.1
= control target key start
LH: loop header
LB: loop body
LE: loop exit
PB: predicated region body
PF: predicated region fallthrough
CT: control target
= control target key end

     0   :  { %8 = vsyncpa [#allocation3], 0  ;;  %s628_s12 = smov 0   ;;  %s630_s13 = smov 0   ;;  %s829_s0 = inlined_call_operand.vmem [shape: f32[26], index: 0, kind: input, shape index: {}]   ;;  %s830_s1 = inlined_call_operand.vmem [shape: f32[3,16,128], index: 1, kind: input, shape index: {}]   ;;  %s831_s2 = inlined_call_operand.vmem [shape: f32[16,128], index: 2, kind: input, shape index: {}]   ;;  %s832_s3 = inlined_call_operand.vmem [shape: f32[8,128], index: 3, kind: output, shape index: {}]  }
   0x1   :  { %s632_s14 = smov 0  }
   0x2 LB: > { %s644_s15 = sadd.s32 4294967295, %s604_s14   ;;  %s647_s16 = sadd.s32 1, %s604_s14   ;;  %s604_s14 = sphi %s632_s14, %s838_s14   ;;  %s600_s13 = sphi %s630_s13, %s837_s13   ;;  %s596_s12 = sphi %s628_s12, %s836_s12  }
   0x3   : > { %s39_s17 = ssub.s32 %s604_s14, %s647_s16  ;;  %s42_s18 = sadd.s32 1, %s600_s13 }
   0x4   : > { %p40_p0 = scmp.eq.s32.totalorder %s39_s17, 0  ;;  %p49_p1 = scmp.ne.s32.totalorder %s600_s13, %s596_s12 }
   0x5   : > { %p50_p2 = scmp.eq.s32.totalorder %s604_s14, 0  ;;  %p488_p3 = scmp.ge.s32.totalorder %s604_s14, 1 }
   0x6   : > { %s657_s19 = scalar_select %p40_p0, %s600_s13, %s42_s18  }
   0x7   : > { %p659_p4 = por %p50_p2, %p49_p1  ;;  %p113_p5 = scmp.lt.s32.totalorder %s604_s14, 3 }
   0x8   : > { %p535_p7 = scmp.eq.s32.totalorder %s644_s15, 0  ;;  %s126_s24 = sshll.u32 %s829_s0, 4  ;;  %s127_s24 = int_to_ptr.vmem [resolvable:$true] %s126_s24 }
   0x9   : > { %p666_p8 = pnand %p488_p3, %p113_p5  ;;  %s563_s25 = scalar_lea.vmem %s127_s24, 16 }
   0xa   : > { %p564_p11 = scmp.ne.s32.totalorder %s127_s24, %s563_s25  ;;  %p571_p1 = scmp.lt.s32.totalorder %s127_s24, %s127_s24 }
   0xb   : > { %p531_p9 = pneg %p666_p8  ;;  %p572_p2 = scmp.lt.s32.totalorder %s563_s25, %s563_s25 }
   0xd   : > { %p532_p10 = pnand %p535_p7, %p531_p9  ;;  %p573_p3 = por %p572_p2, %p571_p1 }
   0xf   : > { %p565_p12 = pneg %p532_p10 }
  0x11   : > { %p566_p13 = pnand %p565_p12, %p564_p11 }
  0x13   : > { %p567_p0 = pneg %p566_p13 }
  0x15   : > { %p574_p5 = pnand %p573_p3, %p567_p0 }
  0x17   : > { %577 = shalt.err (!%p574_p5)
}
  0x18   : > { %s606_s26 = smov [#allocation2]   ;;  %p490_p6 = scmp.ge.s32.totalorder %s604_s14, 2 }
  0x19   : > { %534 = dma.vmem_to_smem (!%p532_p10), %s127_s24, 16, %s606_s26, [#allocation3]  }
  0x1a   : > { %133 = sbr.rel (%p490_p6) target bundleno = 37 (0x25), region = 20 }
  0x1f   : > { %136 = sbr.rel (!%p659_p4) target bundleno = 37 (0x25), region = 24  ;;  %s138_s27 = sand.u32 (%p659_p4), 1, %s600_s13  }
  0x20   : > { %s491_s28 = sshll.u32 (%p659_p4), %s604_s14, 3  ;;  %s525_s29 = smul.u32 (%p659_p4), 24, %s138_s27 }
  0x21   : > { %s142_s5 = scalar_lea.vmem (%p659_p4), %s830_s1, %s491_s28 }
  0x22   : > { %v175_v0 = vld [vmem:[%s142_s5] sm:$0xff] (%p659_p4)  ;;  %v177_v1 = vld [vmem:[%s142_s5 + $0x10] sm:$0xff] (%p659_p4)  ;;  %s140_s6 = scalar_lea.vmem (%p659_p4), [#allocation4], %s525_s29 }
  0x23   : > { %v179_v2 = vld [vmem:[%s142_s5 + $0x20] sm:$0xff] (%p659_p4)  ;;  %176 = vst [vmem:[%s140_s6] sm:$0xff] (%p659_p4), %v175_v0  ;;  %178 = vst [vmem:[%s140_s6 + $0x8] sm:$0xff] (%p659_p4), %v177_v1 }
  0x24   : > { %180 = vst [vmem:[%s140_s6 + $0x10] sm:$0xff] %v179_v2 }
  0x25 PF: > { %196 = sbr.rel (%p666_p8) target bundleno = 118 (0x76), region = 66 }
  0x2a   : > { %591 = dma.done.wait (%p535_p7), [#allocation3], 16  }
  0x2b   : > { %593 = vsyncadd (%p535_p7), [#allocation3], 4294967280  ;;  %s203_s7 = sand.u32 1, %s596_s12  }
  0x2c   : > { %s526_s8 = smul.u32 24, %s203_s7 }
  0x2e   : > { %s205_s9 = scalar_lea.vmem [#allocation4], %s526_s8 }
  0x2f   : > { %209 = sfence }
  0x30   : > { %p226_p4 = scmp.lt.s32.totalorder %s644_s15, 1  ;;  %p835_p6 = scmp.ne.s32.totalorder %s644_s15, 0 }
  0x32   : > { %s227_s10 = scalar_select %p226_p4, %s644_s15, 1 }
  0x33   : > { %233 = sbr.rel (%p835_p6) target bundleno = 58 (0x3a), region = 78 }
  0x34   : > { %s494_s11 = sshll.u32 %s227_s10, 3 }
  0x35   : > { %s697_s18 = scalar_lea.vmem %s831_s2, %s494_s11 }
  0x38   : > { %v607_v3 = vmov 0.0  }
  0x39   : > { %234 = vst [vmem:[%s832_s3] sm:$0xff] %v607_v3 }
  0x3a PF: > { %s235_s12 = sld [smem:[#allocation2]]  ;;  %v706_v4 = vld [vmem:[%s205_s9] sm:$0xff]  ;;  %v708_v6 = vld [vmem:[%s205_s9 + $0x8] sm:$0xff]  ;;  %v717_v11 = vld [vmem:[%s205_s9 + $0x10] sm:$0xff] }
  0x3b   : > { %s496_s22 = sld [smem:[#allocation2 + $0x1]] }
  0x3c   : > { %s497_s23 = sld [smem:[#allocation2 + $0x2]] }
  0x3d   : > { %s498_s24 = sld [smem:[#allocation2 + $0x3]] }
  0x3e   : > { %s499_s25 = sld [smem:[#allocation2 + $0x4]] }
  0x3f   : > { %s704_s26 = sld [smem:[#allocation2 + $0x5]] }
  0x40   : > { %s501_s27 = sld [smem:[#allocation2 + $0x6]]  ;;  %v259_v5 = vstv %s235_s12 }
  0x41   : > { %s502_s28 = sld [smem:[#allocation2 + $0x7]]  ;;  %v261_v7 = vstv %s496_s22  ;;  %v260_v9 = vmul.f32 %v259_v5, %v706_v4 }
  0x42   : > { %s503_s15 = sld [smem:[#allocation2 + $0x8]]  ;;  %v262_v12 = vmul.f32 %v708_v6, %v261_v7  ;;  %v264_v13 = vstv %s497_s23 }
  0x43   : > { %s710_s29 = sld [smem:[#allocation2 + $0x9]]  ;;  %v267_v8 = vstv %s498_s24  ;;  %v265_v20 = vmul.f32 %v717_v11, %v264_v13 }
  0x44   : > { %s712_s30 = sld [smem:[#allocation2 + $0xa]]  ;;  %v269_v10 = vstv %s499_s25  ;;  %v268_v14 = vmul.f32 %v267_v8, %v706_v4  ;;  %v263_v23 = vadd.f32 %v262_v12, %v260_v9 }
  0x45   : > { %s715_s4 = sld [smem:[#allocation2 + $0xb]]  ;;  %v270_v15 = vmul.f32 %v708_v6, %v269_v10  ;;  %v272_v16 = vstv %s704_s26 }
  0x46   : > { %s722_s5 = sld [smem:[#allocation2 + $0xc]]  ;;  %v275_v17 = vstv %s501_s27  ;;  %v273_v25 = vmul.f32 %v717_v11, %v272_v16  ;;  %v266_v31 = vadd.f32 %v265_v20, %v263_v23 }
  0x47   : > { %s725_s6 = sld [smem:[#allocation2 + $0xd]]  ;;  %v276_v18 = vmul.f32 %v275_v17, %v706_v4  ;;  %v277_v19 = vstv %s502_s28  ;;  %v271_v24 = vadd.f32 %v270_v15, %v268_v14 }
  0x48   : > { %s728_s7 = sld [smem:[#allocation2 + $0xe]]  ;;  %v278_v21 = vmul.f32 %v708_v6, %v277_v19  ;;  %v280_v22 = vstv %s503_s15 }
  0x49   : > { %s510_s8 = sld [smem:[#allocation2 + $0xf]]  ;;  %v281_v26 = vmul.f32 %v717_v11, %v280_v22  ;;  %v283_v29 = vstv %s710_s29  ;;  %v274_v32 = vadd.f32 %v273_v25, %v271_v24 }
  0x4a   : > { %s511_s9 = sld [smem:[#allocation2 + $0x10]]  ;;  %v279_v27 = vadd.f32 %v278_v21, %v276_v18  ;;  %v285_v30 = vstv %s712_s30  ;;  %v284_v34 = vadd.f32 %v283_v29, %v266_v31  ;;  %v258_v21 = vld [vmem:[%s697_s18] sm:$0xff] }
  0x4b   : > { %s512_s10 = sld [smem:[#allocation2 + $0x11]]  ;;  %v287_v33 = vstv %s715_s4  ;;  %v286_v35 = vadd.f32 %v285_v30, %v274_v32 }
  0x4c   : > { %v282_v28 = vadd.f32 %v281_v26, %v279_v27  ;;  %s736_s11 = sld [smem:[#allocation2 + $0x12]]  ;;  %v294_v38 = vstv %s722_s5 }
  0x4d   : > { %s738_s14 = sld [smem:[#allocation2 + $0x13]]  ;;  %v300_v49 = vstv %s725_s6 }
  0x4e   : > { %s741_s17 = sld [smem:[#allocation2 + $0x14]]  ;;  %v288_v41 = vadd.f32 %v287_v33, %v282_v28  ;;  %v305_v47 = vstv %s728_s7 }
  0x4f   : > { %v297_v36 = vstv %s510_s8  ;;  %s743_s20 = sld [smem:[#allocation2 + $0x15]] }
  0x50   : > { %v289_v37 = vstv %s511_s9  ;;  %v298_v39 = vmul.f32 %v297_v36, %v282_v28  ;;  %v302_v40 = vmul.f32 %v297_v36, %v274_v32  ;;  %s746_s21 = sld [smem:[#allocation2 + $0x16]] }
  0x51   : > { %v290_v42 = vmul.f32 %v289_v37, %v282_v28  ;;  %v291_v43 = vstv %s512_s10  ;;  %v303_v44 = vmul.f32 %v289_v37, %v266_v31  ;;  %s748_s12 = sld [smem:[#allocation2 + $0x17]] }
  0x52   : > { %v292_v45 = vmul.f32 %v291_v43, %v274_v32  ;;  %v296_v46 = vmul.f32 %v291_v43, %v266_v31  ;;  %v311_v48 = vstv %s736_s11  ;;  %s752_s22 = sld [smem:[#allocation2 + $0x18]] }
  0x53   : > { %v304_v50 = vsub.f32 %v302_v40, %v303_v44  ;;  %v312_v51 = vmul.f32 %v311_v48, %v284_v34  ;;  %v313_v52 = vstv %s738_s14  ;;  %s756_s23 = sld [smem:[#allocation2 + $0x19]] }
  0x54   : > { %v293_v53 = vsub.f32 %v290_v42, %v292_v45  ;;  %v299_v54 = vsub.f32 %v296_v46, %v298_v39  ;;  %v314_v55 = vmul.f32 %v313_v52, %v286_v35  ;;  %v316_v56 = vstv %s741_s17 }
  0x55   : > { %v306_v57 = vadd.f32 %v305_v47, %v304_v50  ;;  %v317_v58 = vmul.f32 %v316_v56, %v288_v41  ;;  %v324_v8 = vstv %s743_s20 }
  0x56   : > { %v295_v59 = vadd.f32 %v294_v38, %v293_v53  ;;  %v301_v60 = vadd.f32 %v300_v49, %v299_v54  ;;  %v315_v61 = vadd.f32 %v314_v55, %v312_v51  ;;  %v372_v62 = vstv %s746_s21  ;;  %v329_v54 = vld [vmem:[%s832_s3] sm:$0x1] }
  0x57   : > { %v322_v63 = vmul.f32 %v316_v56, %v306_v57  ;;  %v373_v0 = vmul.f32 %v372_v62, %v284_v34  ;;  %v374_v1 = vstv %s748_s12 }
  0x58   : > { %v318_v2 = vadd.f32 %v317_v58, %v315_v61  ;;  %v319_v3 = vmul.f32 %v311_v48, %v295_v59  ;;  %v320_v5 = vmul.f32 %v313_v52, %v301_v60  ;;  %v375_v7 = vmul.f32 %v374_v1, %v286_v35 }
  0x59   : > { %v377_v9 = vstv %s752_s22  ;;  %v380_v10 = vmul.f32 %v372_v62, %v295_v59  ;;  %v381_v12 = vmul.f32 %v374_v1, %v301_v60  ;;  %v385_v18 = vstv %s756_s23  ;;  %v338_v60 = vld [vmem:[%s832_s3 + $0x1] sm:$0x1]  ;;  %v358_v1 = vld [vmem:[%s832_s3 + $0x3] sm:$0x1] }
  0x5a   : > { %v321_v13 = vadd.f32 %v320_v5, %v319_v3  ;;  %v376_v14 = vadd.f32 %v375_v7, %v373_v0  ;;  %v378_v15 = vmul.f32 %v377_v9, %v288_v41  ;;  %v383_v17 = vmul.f32 %v377_v9, %v306_v57  ;;  %v348_v0 = vld [vmem:[%s832_s3 + $0x2] sm:$0x1] }
  0x5b   : > { %v382_v16 = vadd.f32 %v381_v12, %v380_v10  ;;  %vm325_vm0 = vcmp.lt.f32.partialorder %v318_v2, %v324_v8 }
  0x5c   : > { %v323_v19 = vadd.f32 %v322_v63, %v321_v13  ;;  %v379_v20 = vadd.f32 %v378_v15, %v376_v14  ;;  %v390_v13 = vld [vmem:[%s832_s3 + $0x4] sm:$0x1] }
  0x5d   : > { %v384_v22 = vadd.f32 %v383_v17, %v382_v16 }
  0x5e   : > { %vm326_vm1 = vcmp.lt.f32.partialorder %v323_v19, 0.0  ;;  %vm386_vm2 = vcmp.lt.f32.partialorder %v379_v20, %v385_v18 }
  0x5f   : > { %vm327_vm3 = vmand %vm325_vm0, %vm326_vm1  ;;  %vm387_vm4 = vcmp.lt.f32.partialorder %v384_v22, 0.0  ;;  %v409_v22 = vld [vmem:[%s832_s3 + $0x6] sm:$0x1] }
  0x60   : > { %v328_v23 = vsel %vm327_vm3, %v258_v21, 0.0  ;;  %vm388_vm5 = vmand %vm386_vm2, %vm387_vm4 }
  0x61   : > { %v330_v24 = vrot.slane %v328_v23, 4  ;;  %v339_v25 = vmul.f32 %v328_v23, %v706_v4  ;;  %v349_v26 = vmul.f32 %v708_v6, %v328_v23  ;;  %v359_v27 = vmul.f32 %v717_v11, %v328_v23 }
  0x62   : > { %v389_v28 = vsel %vm388_vm5, %v258_v21, 0.0  ;;  %v399_v21 = vld [vmem:[%s832_s3 + $0x5] sm:$0x1] }
  0x63   : > { %v331_v29 = vadd.f32 %v330_v24, %v328_v23  ;;  %v340_v30 = vrot.slane %v339_v25, 4  ;;  %v350_v31 = vrot.slane %v349_v26, 4  ;;  %v360_v32 = vrot.slane %v359_v27, 4  ;;  %v419_v23 = vld [vmem:[%s832_s3 + $0x7] sm:$0x1] }
  0x64   : > { %v391_v33 = vrot.slane %v389_v28, 4  ;;  %v400_v34 = vmul.f32 %v389_v28, %v706_v4  ;;  %v410_v35 = vmul.f32 %v708_v6, %v389_v28  ;;  %v420_v36 = vmul.f32 %v717_v11, %v389_v28 }
  0x65   : > { %v332_v37 = vrot.slane %v331_v29, 2  ;;  %v341_v38 = vadd.f32 %v340_v30, %v339_v25  ;;  %v351_v39 = vadd.f32 %v350_v31, %v349_v26  ;;  %v361_v40 = vadd.f32 %v360_v32, %v359_v27 }
  0x66   : > { %v392_v41 = vadd.f32 %v391_v33, %v389_v28  ;;  %v401_v42 = vrot.slane %v400_v34, 4  ;;  %v411_v43 = vrot.slane %v410_v35, 4  ;;  %v421_v44 = vrot.slane %v420_v36, 4 }
  0x67   : > { %v333_v45 = vadd.f32 %v332_v37, %v331_v29  ;;  %v342_v46 = vrot.slane %v341_v38, 2  ;;  %v352_v47 = vrot.slane %v351_v39, 2  ;;  %v362_v48 = vrot.slane %v361_v40, 2 }
  0x68   : > { %v393_v49 = vrot.slane %v392_v41, 2  ;;  %v402_v50 = vadd.f32 %v401_v42, %v400_v34  ;;  %v412_v51 = vadd.f32 %v411_v43, %v410_v35  ;;  %v422_v4 = vadd.f32 %v421_v44, %v420_v36 }
  0x69   : > { %v334_v52 = vrot.slane %v333_v45, 1  ;;  %v343_v6 = vadd.f32 %v342_v46, %v341_v38  ;;  %v353_v53 = vadd.f32 %v352_v47, %v351_v39  ;;  %v363_v11 = vadd.f32 %v362_v48, %v361_v40 }
  0x6a   : > { %v394_v55 = vadd.f32 %v393_v49, %v392_v41  ;;  %v403_v56 = vrot.slane %v402_v50, 2  ;;  %v413_v57 = vrot.slane %v412_v51, 2  ;;  %v423_v58 = vrot.slane %v422_v4, 2 }
  0x6b   : > { %v335_v59 = vadd.f32 %v334_v52, %v333_v45  ;;  %v344_v61 = vrot.slane %v343_v6, 1  ;;  %v354_v62 = vrot.slane %v353_v53, 1  ;;  %v364_v63 = vrot.slane %v363_v11, 1 }
  0x6c   : > { %v395_v2 = vrot.slane %v394_v55, 1  ;;  %v404_v3 = vadd.f32 %v403_v56, %v402_v50  ;;  %v414_v5 = vadd.f32 %v413_v57, %v412_v51  ;;  %v424_v7 = vadd.f32 %v423_v58, %v422_v4 }
  0x6d   : > { %v336_v8 = vadd.f32 %v335_v59, %v329_v54  ;;  %v345_v9 = vadd.f32 %v344_v61, %v343_v6  ;;  %v355_v10 = vadd.f32 %v354_v62, %v353_v53  ;;  %v365_v12 = vadd.f32 %v364_v63, %v363_v11 }
  0x6e   : > { %v396_v14 = vadd.f32 %v395_v2, %v394_v55  ;;  %v405_v15 = vrot.slane %v404_v3, 1  ;;  %v415_v16 = vrot.slane %v414_v5, 1  ;;  %v425_v17 = vrot.slane %v424_v7, 1 }
  0x6f   : > { %337 = vst [vmem:[%s832_s3] sm:$0x1] %v336_v8  ;;  %v346_v18 = vadd.f32 %v345_v9, %v338_v60  ;;  %v356_v19 = vadd.f32 %v355_v10, %v348_v0  ;;  %v366_v20 = vadd.f32 %v365_v12, %v358_v1 }
  0x70   : > { %v397_v24 = vadd.f32 %v396_v14, %v390_v13  ;;  %v406_v25 = vadd.f32 %v405_v15, %v404_v3  ;;  %v416_v26 = vadd.f32 %v415_v16, %v414_v5  ;;  %v426_v27 = vadd.f32 %v425_v17, %v424_v7 }
  0x71   : > { %347 = vst [vmem:[%s832_s3 + $0x1] sm:$0x1] %v346_v18  ;;  %357 = vst [vmem:[%s832_s3 + $0x2] sm:$0x1] %v356_v19 }
  0x72   : > { %367 = vst [vmem:[%s832_s3 + $0x3] sm:$0x1] %v366_v20  ;;  %398 = vst [vmem:[%s832_s3 + $0x4] sm:$0x1] %v397_v24  ;;  %v407_v28 = vadd.f32 %v406_v25, %v399_v21  ;;  %v417_v29 = vadd.f32 %v416_v26, %v409_v22  ;;  %v427_v30 = vadd.f32 %v426_v27, %v419_v23 }
  0x74   : > { %408 = vst [vmem:[%s832_s3 + $0x5] sm:$0x1] %v407_v28  ;;  %418 = vst [vmem:[%s832_s3 + $0x6] sm:$0x1] %v417_v29 }
  0x75   : > { %428 = vst [vmem:[%s832_s3 + $0x7] sm:$0x1] %v427_v30 }
  0x76 PF: > { %p11_p7 = scmp.ge.s32.totalorder %s647_s16, 4   ;;  %s836_s12 = smov %s600_s13 }
  0x77   : > { %s837_s13 = smov %s657_s19  ;;  %s838_s14 = smov %s647_s16 }
  0x78   :  { %13 = sbr.rel (!%p11_p7) target bundleno = 2 (0x2), region = 115 }
  0x7d   :  { %440 = vsyncpa [#allocation3], 1 }
  0x7e   :  { %442 = vsyncpa [#allocation3 + $0x1], 1 }

</bundles_post_ra>
